<compile_context>
chip_gen: v6e
topology: v6e:2x2x1
jax: 0.10.0
libtpu: 0.0.40
codegen_flags: <defaults>
</compile_context>

<pallas_src>
import functools
import math

import jax
import jax.numpy as jnp
from jax.experimental import pallas as pl
from jax.experimental.pallas import tpu as pltpu


def _hmax_kernel(x_ref, o_ref, *, num_windows, window):
    # x_ref: (TM, num_windows * window) lane-dense tile.
    # o_ref: (TM, num_windows) per-window maxima.
    x = x_ref[...]
    if window == 1:
        # Degenerate 1-wide pool: pure copy.
        o_ref[...] = x
    elif num_windows == 1:
        # One window per row: direct lane reduction, no reshape needed.
        o_ref[...] = jnp.max(x, axis=-1, keepdims=True)
    else:
        tm = x.shape[0]
        # Single grouped reduction (one strided lane reduce) instead of
        # per-window slices + concatenate.
        o_ref[...] = jnp.max(x.reshape(tm, num_windows, window), axis=-1)


def horizontal_max_pool2d(x, *,
                          per_buffer_bytes=4 * 1024 * 1024,
                          reshape_buffer_bytes=8 * 1024 * 1024):
    """Pallas TPU implementation of HorizontalMaxPool2d.forward (NCHW)."""
    N, C, H, W = x.shape
    R = N * C * H  # one pooling window per (n, c, h) row

    # Pack P consecutive windows per row so the row width is lane-dense:
    # P_max = 128 // gcd(W, 128) gives width = lcm(W, 128).  Clamp P to a
    # divisor of R so the packing reshape is valid (it preserves memory
    # order, hence window boundaries).
    p_max = 128 // math.gcd(W, 128)
    P = math.gcd(p_max, R)
    rows = R // P
    width = P * W
    xf = x.reshape(rows, width)  # pure reshape: packing preserves memory order

    itemsize = jnp.dtype(x.dtype).itemsize
    row_bytes = width * itemsize
    # The grouped reduce views each row as a (P, W) slab padded to
    # (ceil(P/8)*8 sublanes, ceil(W/128)*128 lanes); keep that within budget.
    if P == 1 or W == 1:
        inter_row_bytes = row_bytes  # no in-kernel reshape on these paths
    else:
        inter_row_bytes = (-(-P // 8) * 8) * (-(-W // 128) * 128) * itemsize

    tm_input = max(1, per_buffer_bytes // row_bytes)
    tm_inter = max(1, reshape_buffer_bytes // inter_row_bytes)
    TM = min(rows, tm_input, tm_inter)
    # Prefer >= 2 grid steps when there is enough work (v7x has 2 TCs).
    if TM >= rows and rows >= 64:
        TM = (rows + 1) // 2
    if TM < rows:
        # Sublane-align partial tiles (32 rows covers f32/bf16/int8 packing).
        if TM >= 32:
            TM = (TM // 32) * 32
        else:
            TM = max(8, (TM // 8) * 8)
        TM = min(TM, rows)
    grid = (pl.cdiv(rows, TM),)

    out = pl.pallas_call(
        functools.partial(_hmax_kernel, num_windows=P, window=W),
        out_shape=jax.ShapeDtypeStruct((rows, P), x.dtype),
        grid=grid,
        in_specs=[pl.BlockSpec((TM, width), lambda i: (i, 0))],
        out_specs=pl.BlockSpec((TM, P), lambda i: (i, 0)),
        compiler_params=pltpu.CompilerParams(
            dimension_semantics=("parallel",),
            vmem_limit_bytes=32 * 1024 * 1024,
        ),
    )(xf)

    # Row-major flattening of (rows, P) == original (N*C*H,) window order.
    return out.reshape(N, C, H, 1)


if __name__ == "__main__":
    key = jax.random.PRNGKey(0)
    N, C, H, W = 2, 4, 16, 16
    x = jax.random.normal(key, (N, C, H, W), dtype=jnp.float32)

    y = horizontal_max_pool2d(x)
    jax.block_until_ready(y)

    # Reference check against plain JAX (== F.max_pool2d with kernel (1, W)).
    y_ref = jnp.max(x, axis=3, keepdims=True)
    assert y.shape == (N, C, H, 1), y.shape
    assert jnp.allclose(y, y_ref), "mismatch vs reference"

    print("KERNEL_OK")
</pallas_src>

<mosaic_0001>
module attributes {stable_mosaic.version = 11 : i64} {
  func.func @_hmax_kernel(%arg0: i32, %arg1: memref<16x128xf32, #tpu.memory_space<vmem>>, %arg2: memref<16x8xf32, #tpu.memory_space<vmem>>) attributes {dimension_semantics = [#tpu.dimension_semantics<parallel>], iteration_bounds = array<i64: 1>, scalar_prefetch = 0 : i64, scratch_operands = 0 : i64, tpu.core_type = #tpu.core_type<tc>, window_params = [{transform_indices = @transform_0, window_bounds = array<i64: 16, 128>}, {transform_indices = @transform_1, window_bounds = array<i64: 16, 8>}]} {
    %c0 = arith.constant 0 : index
    %c0_0 = arith.constant 0 : index
    %0 = vector.load %arg1[%c0, %c0_0] : memref<16x128xf32, #tpu.memory_space<vmem>>, vector<16x128xf32>
    %1 = vector.shape_cast %0 : vector<16x128xf32> to vector<16x8x16xf32>
    %cst = arith.constant dense<0xFF800000> : vector<16x8xf32>
    %2 = vector.multi_reduction <maximumf>, %1, %cst [2] : vector<16x8x16xf32> to vector<16x8xf32>
    %c0_1 = arith.constant 0 : index
    %c0_2 = arith.constant 0 : index
    %3 = vector.load %arg2[%c0_1, %c0_2] : memref<16x8xf32, #tpu.memory_space<vmem>>, vector<16x8xf32>
    tpu.vector_store %arg2[%c0_1, %c0_2], %2 {strides = array<i32>} : memref<16x8xf32, #tpu.memory_space<vmem>>, vector<16x8xf32>,
    return
  }
  func.func @transform_0(%arg0: i32) -> (i32, i32) {
    %c0_i32 = arith.constant 0 : i32
    %c0_i32_0 = arith.constant 0 : i32
    return %arg0, %c0_i32 : i32, i32
  }
  func.func @transform_1(%arg0: i32) -> (i32, i32) {
    %c0_i32 = arith.constant 0 : i32
    %c0_i32_0 = arith.constant 0 : i32
    return %arg0, %c0_i32 : i32, i32
  }
}

</mosaic_0001>

<bundles_post_ra>
// kernel: tpu_custom_call.1
= control target key start
LH: loop header
LB: loop body
LE: loop exit
PB: predicated region body
PF: predicated region fallthrough
CT: control target
= control target key end

     0   :  { %6 = vsyncpa [#allocation3], 0  ;;  %s536_s6 = smov [#allocation2]   ;;  %s699_s0 = inlined_call_operand.hbm [shape: f32[16,128], index: 0, kind: input, shape index: {}]   ;;  %s700_s1 = inlined_call_operand.vmem [shape: f32[16,8], index: 1, kind: output, shape index: {}]  }
   0x1   :  { %s12_s7 = sshll.u32 %s536_s6, 4  ;;  %s13_s7 = int_to_ptr.vmem [resolvable:$true] %s12_s7 }
   0x2   :  { %s522_s8 = scalar_lea.vmem %s13_s7, 256  ;;  %p527_p1 = scmp.lt.s32.totalorder %s13_s7, %s13_s7 }
   0x3   :  { %p523_p0 = scmp.ne.s32.totalorder %s13_s7, %s522_s8  ;;  %p528_p2 = scmp.lt.s32.totalorder %s522_s8, %s522_s8 }
   0x5   :  { %p529_p3 = por %p528_p2, %p527_p1 }
   0x7   :  { %p530_p4 = pnand %p529_p3, %p523_p0 }
   0x9   :  { %533 = shalt.err (!%p530_p4)
}
   0xa   :  { %s537_s9 = smov 128   ;;  %s538_s10 = smov 8  }
   0xb   :  { %18 = dma.hbm_to_vmem [thread:$0]  %s699_s0, 256, %s13_s7, [#allocation3], %s537_s9, %s537_s9, %s538_s10  }
   0xc   :  { %534 = dma.done.wait [#allocation3], 256  }
   0xd   :  { %535 = vsyncadd [#allocation3], 4294967040  ;;  %v561_v0 = vld [vmem:[#allocation2] sm:$0xff]  ;;  %s539_s13 = smov 96   ;;  %s540_s14 = smov 112   ;;  %v565_v1 = vld [vmem:[#allocation2 + $0x8] sm:$0xff]  ;;  %v73_v2 = vlaneseq }
   0xe   :  { %32 = vrot.lane.b32.xlu1 %v561_v0, %s539_s13  ;;  %26 = vrot.lane.b32.xlu0 %v561_v0, %s540_s14  ;;  %s541_s15 = smov 80   ;;  %s542_s0 = smov 64   ;;  %v546_v14 = vmov 1983009808   ;;  %v547_v22 = vmov 1934713408  }
   0xf   :  { %s543_s16 = smov 48   ;;  %s544_s17 = smov 32   ;;  %v74_v3 = vshrl.u32 %v73_v2, 7  ;;  %v406_v4 = vand.u32 127, %v73_v2  ;;  %v71_v15 = vunpack.c.l.s4 %v546_v14  ;;  %v135_v23 = vunpack.c.l.s4 %v547_v22 }
  0x10   :  { %s545_s18 = smov 16   ;;  %vm340_vm0 = vcmask 130048   ;;  %vm471_vm1 = vcmask 1041409   ;;  %vm473_vm2 = vcmask 1042434   ;;  %vm475_vm3 = vcmask 1043459  }
  0x11   :  { %v579_v5 = vsub.s32 %v406_v4, %v74_v3  ;;  %v72_v18 = vunpack.c.0.s8 %v71_v15  ;;  %v136_v33 = vunpack.c.0.s8 %v135_v23  ;;  %vm477_vm4 = vcmask 1044484  }
  0x12   :  { %34 = vrot.lane.b32.xlu1 %v565_v1, %s539_s13  ;;  %28 = vrot.lane.b32.xlu0 %v565_v1, %s540_s14  ;;  %vm479_vm5 = vcmask 1045509   ;;  %vm481_vm6 = vcmask 1046534   ;;  %vm483_vm7 = vcmask 1047559   ;;  %vm494_vm8 = vcmask 64512  }
  0x13   :  { %v593_v24 = vsub.s32 %v72_v18, %v74_v3  ;;  %v611_v45 = vsub.s32 %v136_v33, %v74_v3 }
  0x16   :  { %40 = vrot.lane.b32.xlu1 %v565_v1, %s541_s15  ;;  %38 = vrot.lane.b32.xlu0 %v561_v0, %s541_s15 }
  0x1a   :  { %46 = vrot.lane.b32.xlu1 %v565_v1, %s542_s0  ;;  %44 = vrot.lane.b32.xlu0 %v561_v0, %s542_s0 }
  0x1e   :  { %52 = vrot.lane.b32.xlu1 %v565_v1, %s543_s16  ;;  %50 = vrot.lane.b32.xlu0 %v561_v0, %s543_s16 }
  0x22   :  { %58 = vrot.lane.b32.xlu1 %v565_v1, %s544_s17  ;;  %56 = vrot.lane.b32.xlu0 %v561_v0, %s544_s17 }
  0x26   :  { %64 = vrot.lane.b32.xlu1 %v565_v1, %s545_s18  ;;  %62 = vrot.lane.b32.xlu0 %v561_v0, %s545_s18 }
  0x80   :  { %v33_v6 = vpop.permute.xlu1 %32  ;;  %v27_v7 = vpop.permute.xlu0 %26 }
  0x81   :  { %v68_v25 = vcombine.low %v561_v0, %v33_v6  ;;  %v69_v53 = vcombine.high %v561_v0, %v33_v6 }
  0x83   :  { %v76_v36 = vrot.slane %v68_v25, %v593_v24  ;;  %v83_v2 = vrot.slane %v69_v53, %v593_v24 }
  0x84   :  { %v581_v8 = vpop.permute.xlu1 %34  ;;  %v583_v9 = vpop.permute.xlu0 %28 }
  0x85   :  { %v204_v26 = vcombine.low %v565_v1, %v581_v8 }
  0x87   :  { %v212_v37 = vrot.slane %v204_v26, %v593_v24 }
  0x88   :  { %v585_v10 = vpop.permute.xlu1 %40  ;;  %v39_v11 = vpop.permute.xlu0 %38 }
  0x89   :  { %v84_v19 = vcombine.low %v27_v7, %v39_v11  ;;  %v220_v27 = vcombine.low %v583_v9, %v585_v10  ;;  %v85_v46 = vcombine.high %v27_v7, %v39_v11  ;;  %v221_v18 = vcombine.high %v583_v9, %v585_v10 }
  0x8b   :  { %v92_v29 = vrot.slane %v84_v19, %v593_v24  ;;  %v228_v38 = vrot.slane %v220_v27, %v593_v24  ;;  %v99_v59 = vrot.slane %v85_v46, %v593_v24 }
  0x8c   :  { %v587_v12 = vpop.permute.xlu1 %46  ;;  %v45_v13 = vpop.permute.xlu0 %44 }
  0x8d   :  { %v132_v43 = vcombine.low %v76_v36, %v92_v29  ;;  %v268_v49 = vcombine.low %v212_v37, %v228_v38  ;;  %v133_v50 = vcombine.high %v76_v36, %v92_v29  ;;  %v148_v19 = vcombine.low %v83_v2, %v99_v59 }
  0x8f   :  { %v140_v55 = vrot.slane %v132_v43, %v611_v45  ;;  %v147_v63 = vrot.slane %v133_v50, %v611_v45  ;;  %v276_v0 = vrot.slane %v268_v49, %v611_v45  ;;  %v156_v9 = vrot.slane %v148_v19, %v611_v45 }
  0x90   :  { %v589_v16 = vpop.permute.xlu1 %52  ;;  %v51_v17 = vpop.permute.xlu0 %50 }
  0x94   :  { %v591_v20 = vpop.permute.xlu1 %58  ;;  %v57_v21 = vpop.permute.xlu0 %56 }
  0x95   :  { %v236_v28 = vcombine.low %v587_v12, %v591_v20  ;;  %v100_v30 = vcombine.low %v45_v13, %v57_v21  ;;  %v101_v47 = vcombine.high %v45_v13, %v57_v21  ;;  %v237_v15 = vcombine.high %v587_v12, %v591_v20 }
  0x97   :  { %v244_v39 = vrot.slane %v236_v28, %v593_v24  ;;  %v108_v44 = vrot.slane %v100_v30, %v593_v24  ;;  %v115_v60 = vrot.slane %v101_v47, %v593_v24  ;;  %v251_v27 = vrot.slane %v237_v15, %v593_v24 }
  0x98   :  { %v65_v31 = vpop.permute.xlu1 %64  ;;  %v63_v32 = vpop.permute.xlu0 %62 }
  0x99   :  { %v252_v34 = vcombine.low %v589_v16, %v65_v31  ;;  %v116_v35 = vcombine.low %v51_v17, %v63_v32  ;;  %v117_v41 = vcombine.high %v51_v17, %v63_v32  ;;  %v253_v3 = vcombine.high %v589_v16, %v65_v31 }
  0x9a   :  { %v205_v17 = vcombine.high %v565_v1, %v581_v8  ;;  %v269_v16 = vcombine.high %v212_v37, %v228_v38  ;;  %v235_v8 = vrot.slane %v221_v18, %v593_v24 }
  0x9b   :  { %v260_v40 = vrot.slane %v252_v34, %v593_v24  ;;  %v124_v42 = vrot.slane %v116_v35, %v593_v24  ;;  %v131_v54 = vrot.slane %v117_v41, %v593_v24  ;;  %v267_v21 = vrot.slane %v253_v3, %v593_v24 }
  0x9c   :  { %v219_v1 = vrot.slane %v205_v17, %v593_v24  ;;  %v283_v10 = vrot.slane %v269_v16, %v611_v45  ;;  %v149_v35 = vcombine.high %v83_v2, %v99_v59 }
  0x9d   :  { %v300_v48 = vcombine.low %v244_v39, %v260_v40  ;;  %v164_v51 = vcombine.low %v108_v44, %v124_v42  ;;  %v165_v52 = vcombine.high %v108_v44, %v124_v42  ;;  %v301_v4 = vcombine.high %v244_v39, %v260_v40 }
  0x9e   :  { %v180_v6 = vcombine.low %v115_v60, %v131_v54  ;;  %v316_v28 = vcombine.low %v251_v27, %v267_v21  ;;  %v181_v29 = vcombine.high %v115_v60, %v131_v54  ;;  %v284_v34 = vcombine.low %v219_v1, %v235_v8 }
  0x9f   :  { %v172_v56 = vrot.slane %v164_v51, %v611_v45  ;;  %v179_v57 = vrot.slane %v165_v52, %v611_v45  ;;  %v308_v58 = vrot.slane %v300_v48, %v611_v45  ;;  %v315_v23 = vrot.slane %v301_v4, %v611_v45 }
  0xa0   :  { %v188_v22 = vrot.slane %v180_v6, %v611_v45  ;;  %v195_v36 = vrot.slane %v181_v29, %v611_v45  ;;  %v324_v24 = vrot.slane %v316_v28, %v611_v45  ;;  %v163_v41 = vrot.slane %v149_v35, %v611_v45 }
  0xa1   :  { %v197_v61 = vcombine.high %v140_v55, %v172_v56  ;;  %v196_v62 = vcombine.low %v140_v55, %v172_v56  ;;  %v198_v13 = vcombine.low %v147_v63, %v179_v57  ;;  %v332_v14 = vcombine.low %v276_v0, %v308_v58 }
  0xa2   :  { %v199_v20 = vcombine.high %v147_v63, %v179_v57  ;;  %v333_v26 = vcombine.high %v276_v0, %v308_v58  ;;  %v200_v32 = vcombine.low %v156_v9, %v188_v22  ;;  %v334_v33 = vcombine.low %v283_v10, %v315_v23 }
  0xa3   :  { %v344_v7 = vsel %vm340_vm0, %v197_v61, -inf  ;;  %v341_v11 = vsel %vm340_vm0, %v196_v62, -inf  ;;  %v347_v25 = vsel %vm340_vm0, %v198_v13, -inf  ;;  %v365_v12 = vsel %vm340_vm0, %v332_v14, -inf }
  0xa4   :  { %345 = vmax.xlane.f32.xlu1 %v344_v7  ;;  %342 = vmax.xlane.f32.xlu0 %v341_v11  ;;  %v350_v30 = vsel %vm340_vm0, %v199_v20, -inf  ;;  %v368_v31 = vsel %vm340_vm0, %v333_v26, -inf  ;;  %v353_v37 = vsel %vm340_vm0, %v200_v32, -inf  ;;  %v371_v38 = vsel %vm340_vm0, %v334_v33, -inf }
  0xa5   :  { %v201_v39 = vcombine.high %v156_v9, %v188_v22  ;;  %v335_v40 = vcombine.high %v283_v10, %v315_v23  ;;  %v292_v42 = vrot.slane %v284_v34, %v611_v45  ;;  %v317_v43 = vcombine.high %v251_v27, %v267_v21 }
  0xa6   :  { %v202_v47 = vcombine.low %v163_v41, %v195_v36  ;;  %v285_v49 = vcombine.high %v219_v1, %v235_v8  ;;  %v203_v53 = vcombine.high %v163_v41, %v195_v36 }
  0xa7   :  { %v356_v44 = vsel %vm340_vm0, %v201_v39, -inf  ;;  %v374_v46 = vsel %vm340_vm0, %v335_v40, -inf  ;;  %v336_v48 = vcombine.low %v292_v42, %v324_v24  ;;  %v331_v50 = vrot.slane %v317_v43, %v611_v45 }
  0xa8   :  { %348 = vmax.xlane.f32.xlu1 %v347_v25  ;;  %366 = vmax.xlane.f32.xlu0 %v365_v12  ;;  %v359_v51 = vsel %vm340_vm0, %v202_v47, -inf  ;;  %v337_v54 = vcombine.high %v292_v42, %v324_v24  ;;  %v299_v55 = vrot.slane %v285_v49, %v611_v45  ;;  %v362_v56 = vsel %vm340_vm0, %v203_v53, -inf }
  0xa9   :  { %v377_v52 = vsel %vm340_vm0, %v336_v48, -inf }
  0xaa   :  { %v380_v57 = vsel %vm340_vm0, %v337_v54, -inf  ;;  %v338_v58 = vcombine.low %v299_v55, %v331_v50  ;;  %v339_v60 = vcombine.high %v299_v55, %v331_v50 }
  0xac   :  { %351 = vmax.xlane.f32.xlu1 %v350_v30  ;;  %369 = vmax.xlane.f32.xlu0 %v368_v31  ;;  %v383_v59 = vsel %vm340_vm0, %v338_v58, -inf  ;;  %v386_v61 = vsel %vm340_vm0, %v339_v60, -inf }
  0xb0   :  { %354 = vmax.xlane.f32.xlu1 %v353_v37  ;;  %372 = vmax.xlane.f32.xlu0 %v371_v38 }
  0xb4   :  { %357 = vmax.xlane.f32.xlu1 %v356_v44  ;;  %375 = vmax.xlane.f32.xlu0 %v374_v46 }
  0xb8   :  { %360 = vmax.xlane.f32.xlu1 %v359_v51  ;;  %378 = vmax.xlane.f32.xlu0 %v377_v52 }
  0xbc   :  { %363 = vmax.xlane.f32.xlu1 %v362_v56  ;;  %381 = vmax.xlane.f32.xlu0 %v380_v57 }
  0xc0   :  { %384 = vmax.xlane.f32.xlu0 %v383_v59 }
  0xc4   :  { %387 = vmax.xlane.f32.xlu0 %v386_v61 }
 0x12d   :  { %v346_v62 = vpop.xlane.xlu1 %345  ;;  %v343_v63 = vpop.xlane.xlu0 %342 }
 0x12e   :  { %v414_v13 = vrot.slane %v346_v62, %v579_v5  ;;  %v410_v14 = vrot.slane %v343_v63, %v579_v5 }
 0x130   :  { %v472_v21 = vsel %vm471_vm1, %v414_v13, %v410_v14 }
 0x131   :  { %v349_v0 = vpop.xlane.xlu1 %348  ;;  %v367_v2 = vpop.xlane.xlu0 %366 }
 0x132   :  { %v418_v15 = vrot.slane %v349_v0, %v579_v5  ;;  %v442_v29 = vrot.slane %v367_v2, %v579_v5 }
 0x134   :  { %v474_v23 = vsel %vm473_vm2, %v418_v15, %v472_v21 }
 0x135   :  { %v352_v3 = vpop.xlane.xlu1 %351  ;;  %v370_v45 = vpop.xlane.xlu0 %369 }
 0x136   :  { %v422_v17 = vrot.slane %v352_v3, %v579_v5  ;;  %v446_v1 = vrot.slane %v370_v45, %v579_v5 }
 0x138   :  { %v476_v12 = vsel %vm475_vm3, %v422_v17, %v474_v23  ;;  %v485_v34 = vsel %vm471_vm1, %v446_v1, %v442_v29 }
 0x139   :  { %v355_v4 = vpop.xlane.xlu1 %354  ;;  %v373_v6 = vpop.xlane.xlu0 %372 }
 0x13a   :  { %v426_v18 = vrot.slane %v355_v4, %v579_v5  ;;  %v450_v10 = vrot.slane %v373_v6, %v579_v5 }
 0x13c   :  { %v478_v20 = vsel %vm477_vm4, %v426_v18, %v476_v12  ;;  %v486_v36 = vsel %vm473_vm2, %v450_v10, %v485_v34 }
 0x13d   :  { %v358_v7 = vpop.xlane.xlu1 %357  ;;  %v376_v11 = vpop.xlane.xlu0 %375 }
 0x13e   :  { %v430_v22 = vrot.slane %v358_v7, %v579_v5  ;;  %v454_v30 = vrot.slane %v376_v11, %v579_v5 }
 0x140   :  { %v480_v8 = vsel %vm479_vm5, %v430_v22, %v478_v20  ;;  %v487_v37 = vsel %vm475_vm3, %v454_v30, %v486_v36 }
 0x141   :  { %v361_v16 = vpop.xlane.xlu1 %360  ;;  %v379_v19 = vpop.xlane.xlu0 %378 }
 0x142   :  { %v434_v25 = vrot.slane %v361_v16, %v579_v5  ;;  %v458_v32 = vrot.slane %v379_v19, %v579_v5 }
 0x144   :  { %v482_v28 = vsel %vm481_vm6, %v434_v25, %v480_v8  ;;  %v488_v38 = vsel %vm477_vm4, %v458_v32, %v487_v37 }
 0x145   :  { %v364_v26 = vpop.xlane.xlu1 %363  ;;  %v382_v27 = vpop.xlane.xlu0 %381 }
 0x146   :  { %v438_v9 = vrot.slane %v364_v26, %v579_v5  ;;  %v462_v35 = vrot.slane %v382_v27, %v579_v5 }
 0x148   :  { %v484_v31 = vsel %vm483_vm7, %v438_v9, %v482_v28  ;;  %v489_v40 = vsel %vm479_vm5, %v462_v35, %v488_v38 }
 0x149   :  { %495 = vst.msk [vmem:[%s700_s1] sm:$0xff] %vm494_vm8, %v484_v31  ;;  %v385_v33 = vpop.xlane.xlu0 %384 }
 0x14a   :  { %v466_v24 = vrot.slane %v385_v33, %v579_v5 }
 0x14c   :  { %v490_v42 = vsel %vm481_vm6, %v466_v24, %v489_v40 }
 0x14d   :  { %v388_v39 = vpop.xlane.xlu0 %387 }
 0x14e   :  { %v470_v41 = vrot.slane %v388_v39, %v579_v5 }
 0x150   :  { %v491_v43 = vsel %vm483_vm7, %v470_v41, %v490_v42 }
 0x151   :  { %496 = vst.msk [vmem:[%s700_s1 + $0x8] sm:$0xff] %vm494_vm8, %v491_v43 }
 0x152   :  { %501 = vsyncpa [#allocation3], 1 }

</bundles_post_ra>
